<compile_context>
chip_gen: v6e
topology: v6e:2x2x1
jax: 0.10.0
libtpu: 0.0.40
codegen_flags: <defaults>
</compile_context>

<pallas_src>
import functools
import math

import jax
import jax.numpy as jnp
from jax.experimental import pallas as pl
from jax.experimental.pallas import tpu as pltpu


def _round_up(x, m):
    return ((x + m - 1) // m) * m


def _detect_vmem_capacity_bytes():
    # generation-aware VMEM sizing (v5e/v6e: 128 MiB, v7x: 64 MiB per TC)
    try:
        cap = int(pltpu.get_tpu_info().vmem_capacity_bytes)
        if cap > 0:
            return cap
    except Exception:
        pass
    return 64 * 1024 * 1024  # conservative fallback (v7x per-TC)


_VMEM_CAP = _detect_vmem_capacity_bytes()
# live (double-buffered) block bytes per kernel; leaves headroom on all gens
_BLOCK_BUDGET = min(_VMEM_CAP // 4, 16 * 1024 * 1024)
# explicit scoped-VMEM limit (raises v5e's 16 MiB default, stays inside v7x's 64 MiB)
_VMEM_LIMIT = min((_VMEM_CAP * 3) // 4, 96 * 1024 * 1024)


# ----------------------------------------------------------------------------
# Pallas kernel 1: ScalarMix (weighted sum over layers), lane-dense tiles
# ----------------------------------------------------------------------------
def _scalar_mix_kernel(coeff_ref, h_ref, o_ref, *, n_layers):
    # coeff_ref: SMEM (n_layers,) f32 ; h_ref: VMEM (n_layers, TR, 128) ; o_ref: (TR, 128)
    acc = coeff_ref[0] * h_ref[0].astype(jnp.float32)      # f32 accumulation
    for k in range(1, n_layers):
        acc = acc + coeff_ref[k] * h_ref[k].astype(jnp.float32)
    o_ref[...] = acc.astype(o_ref.dtype)


def scalar_mix(hidden, coeffs, out_dtype=None):
    """Weighted layer mix.  hidden: [n_layers, ...] -> [...] in out_dtype."""
    n_layers = hidden.shape[0]
    out_struct = hidden.shape[1:]
    if out_dtype is None:
        out_dtype = hidden.dtype
    n = math.prod(out_struct)
    lanes = 128

    # lane-dense (rows, 128) view; pad only the (<128 element) lane remainder —
    # never a full-tensor copy (real H that is a multiple of 128 needs no pad).
    n_lane = _round_up(n, lanes)
    flat = hidden.reshape(n_layers, n)
    if n_lane != n:
        flat = jnp.pad(flat, ((0, 0), (0, n_lane - n)))
    rows = n_lane // lanes
    h3 = flat.reshape(n_layers, rows, lanes)

    # biggest row tile that fits the per-kernel VMEM block budget (double-buffered)
    in_b = jnp.dtype(hidden.dtype).itemsize
    out_b = jnp.dtype(out_dtype).itemsize
    bytes_per_row = 2 * lanes * (n_layers * in_b + out_b)
    tile_rows = max(8, min(_BLOCK_BUDGET // bytes_per_row, 2048) // 8 * 8)
    if rows > 8:  # keep >= 2 grid steps so both v7x TensorCores get work
        tile_rows = min(tile_rows, _round_up(pl.cdiv(rows, 2), 8))
    tile_rows = max(8, min(tile_rows, _round_up(rows, 8)))
    grid_n = pl.cdiv(rows, tile_rows)      # partial last block handled by Pallas

    kernel = functools.partial(_scalar_mix_kernel, n_layers=n_layers)
    out = pl.pallas_call(
        kernel,
        out_shape=jax.ShapeDtypeStruct((rows, lanes), out_dtype),
        grid=(grid_n,),
        in_specs=[
            pl.BlockSpec(memory_space=pltpu.MemorySpace.SMEM),
            pl.BlockSpec((n_layers, tile_rows, lanes), lambda i: (0, i, 0)),
        ],
        out_specs=pl.BlockSpec((tile_rows, lanes), lambda i: (i, 0)),
        compiler_params=pltpu.CompilerParams(
            dimension_semantics=("parallel",),
            vmem_limit_bytes=_VMEM_LIMIT,
        ),
    )(coeffs.astype(jnp.float32), h3)
    out = out.reshape(n_lane)
    if n_lane != n:
        out = out[:n]
    return out.reshape(out_struct)


# ----------------------------------------------------------------------------
# Pallas kernel 2: piece pooling folded into the projection matmul (K = F*H)
# ----------------------------------------------------------------------------
def _pool_project_kernel(x_ref, w_ref, s_ref, o_ref):
    # x_ref: (TM, F*H) bf16 ; w_ref: (F*H, Npad) bf16 (W replicated F times on rows)
    # s_ref: (TM, 1) f32 (1/len per token) ; o_ref: (TM, Npad) f32
    acc = jnp.dot(x_ref[...], w_ref[...], preferred_element_type=jnp.float32)
    o_ref[...] = (acc * s_ref[...]).astype(o_ref.dtype)


def pool_and_project(pieces, inv_lens, w):
    """((sum_f pieces[b,s,f]) @ w) * inv_lens[b,s].

    pieces: [B, S, F, H] (masked pieces, cast to bf16 operands),
    inv_lens: [B, S] f32, w: [H, n_out].  Returns [B, S, n_out] float32.
    """
    B, S, F, H = pieces.shape
    n_out = w.shape[1]
    M, FH = B * S, F * H
    n_pad = _round_up(n_out, 128)          # lane-dense output, no masked stores

    x = pieces.astype(jnp.bfloat16).reshape(M, FH)
    s = inv_lens.astype(jnp.float32).reshape(M, 1)
    # fold the F-axis pooling into the MXU contraction: W replicated F times
    w_rep = jnp.tile(w.astype(jnp.bfloat16), (F, 1))
    if n_pad != n_out:
        w_rep = jnp.pad(w_rep, ((0, 0), (0, n_pad - n_out)))

    # biggest M tile that fits the VMEM block budget next to the resident weight
    # TODO(synk): pipeline_mode=pl.Buffered(1) on the constant weight BlockSpec
    # would drop its second VMEM buffer; omitted to stay conservative.
    w_bytes = 2 * FH * n_pad * 2                  # double-buffered bf16 weight
    row_bytes = 2 * (FH * 2 + n_pad * 4 + 4)      # double-buffered x / out / scale per row
    avail = max(_BLOCK_BUDGET - w_bytes, 8 * row_bytes)
    cap = max(8, min(512, (avail // row_bytes) // 8 * 8))
    m8 = _round_up(M, 8)
    if m8 <= cap:
        tile_m = _round_up(pl.cdiv(m8, 2), 8) if m8 > 8 else 8   # >= 2 grid steps (megacore)
    else:
        tile_m = (cap // 128) * 128 if cap >= 128 else cap       # MXU/lane friendly
    grid_n = pl.cdiv(M, tile_m)            # partial last block handled by Pallas

    out = pl.pallas_call(
        _pool_project_kernel,
        out_shape=jax.ShapeDtypeStruct((M, n_pad), jnp.float32),  # explicit f32 output
        grid=(grid_n,),
        in_specs=[
            pl.BlockSpec((tile_m, FH), lambda i: (i, 0)),
            pl.BlockSpec((FH, n_pad), lambda i: (0, 0)),          # resident weight
            pl.BlockSpec((tile_m, 1), lambda i: (i, 0)),
        ],
        out_specs=pl.BlockSpec((tile_m, n_pad), lambda i: (i, 0)),
        compiler_params=pltpu.CompilerParams(
            dimension_semantics=("parallel",),
            vmem_limit_bytes=_VMEM_LIMIT,
        ),
    )(x, w_rep, s)
    return out[:, :n_out].reshape(B, S, n_out)


# ----------------------------------------------------------------------------
# Deterministic stand-in for the pretrained transformer backbone
# ----------------------------------------------------------------------------
# TODO(synk): the HuggingFace pretrained encoder cannot be reproduced in-script;
# it is replaced by a deterministic synthetic encoder with the same interface.
def synthetic_bert(subword_ids, attn_mask_f, params):
    emb = params["layer_emb"]                              # [n_layers, vocab, H]
    pos = params["pos_emb"]                                # [n_layers, L, H]
    hidden = emb[:, subword_ids, :] + pos[:, None, :, :]   # [n_layers, B, L, H]
    hidden = hidden * attn_mask_f[None, :, :, None]
    # synthetic attention for the configured attention_layer
    q = jnp.einsum("bld,hde->bhle", hidden[-1], params["wq"])
    k = jnp.einsum("bld,hde->bhle", hidden[-1], params["wk"])
    scores = jnp.einsum("bhld,bhmd->bhlm", q, k) / jnp.sqrt(jnp.float32(q.shape[-1]))
    scores = jnp.where(attn_mask_f[:, None, None, :] > 0, scores, -1e9)
    attn = jax.nn.softmax(scores, axis=-1)                 # [B, heads, L, L]
    return hidden, attn


# ----------------------------------------------------------------------------
# TransformerEmbedding.forward (pooling='mean', padding_side='right')
# ----------------------------------------------------------------------------
def transformer_embedding_forward(subwords, params, *, pad_index=0, attention_head=0):
    B, S, F = subwords.shape
    mask = subwords != pad_index                           # [B, S, F]
    SF = S * F
    mask_flat = mask.reshape(B, SF)
    lens = mask_flat.sum(1)

    # pad(subwords[mask].split(lens), pad_index, padding_side='right'):
    # left-compact real sub-words per batch row (static padded length SF).
    order = jnp.argsort(~mask_flat, axis=1, stable=True)
    sub_flat = jnp.take_along_axis(subwords.reshape(B, SF), order, axis=1)
    bert_mask = jnp.arange(SF)[None, :] < lens[:, None]
    sub_flat = jnp.where(bert_mask, sub_flat, pad_index)

    # TODO(synk): stride loop for sequences longer than max_len-2 omitted
    # (SF < max_len at these shapes, so the torch loop body never executes).
    hidden, attn_all = synthetic_bert(sub_flat, bert_mask.astype(jnp.float32), params)

    # ScalarMix (Pallas kernel 1). dropout=0 -> plain softmax weights.
    # bf16 output halves kernel-1 writeback and the downstream gather traffic;
    # kernel 2 consumes bf16 MXU operands anyway (f32 accumulation inside).
    coeffs = (params["gamma"] * jax.nn.softmax(params["mix_weights"])).astype(jnp.float32)
    bert = scalar_mix(hidden, coeffs, out_dtype=jnp.bfloat16)   # [B, SF, H] bf16

    # masked_scatter of bert[bert_mask] back into [B, S, F, H] (bf16 pieces).
    # TODO(synk): this gather could be fused into kernel 2 with
    # PrefetchScalarGridSpec (per-piece source-row indices + inv_lens in SMEM)
    # to avoid materializing the F-expanded tensor; kept as plain-JAX glue here.
    pos = jnp.cumsum(mask_flat.astype(jnp.int32), axis=1) - 1
    pos_c = jnp.clip(pos, 0, SF - 1)
    gathered = jnp.take_along_axis(bert, pos_c[:, :, None], axis=1)
    pieces = jnp.where(mask_flat[:, :, None], gathered,
                       jnp.zeros((), bert.dtype)).reshape(B, S, F, -1)

    # mean pooling: the 1/len scale is applied inside kernel 2 (post-matmul, f32).
    # TODO(synk): pooling='first'/'last' variants not implemented (default 'mean').
    bert_lens = jnp.maximum(mask.sum(-1), 1)
    inv_lens = 1.0 / bert_lens.astype(jnp.float32)         # [B, S]
    embed = pool_and_project(pieces, inv_lens, params["proj_w"])   # [B, S, n_out] f32

    # token-level attention (seq_attn): gather attention between first sub-tokens
    attn = attn_all[:, attention_head]                     # [B, SF, SF]
    tok_first = mask[:, :, 0]                              # [B, S]
    firstpos = pos_c.reshape(B, S, F)[:, :, 0]
    t_order = jnp.argsort(~tok_first, axis=1, stable=True)
    fp_compact = jnp.take_along_axis(firstpos, t_order, axis=1)
    n_tok = tok_first.sum(1)
    valid = jnp.arange(S)[None, :] < n_tok[:, None]
    bidx = jnp.arange(B)[:, None, None]
    seq_attn = attn[bidx, fp_compact[:, :, None], fp_compact[:, None, :]]
    seq_attn = jnp.where(valid[:, :, None] & valid[:, None, :], seq_attn, 0.0)
    return embed, seq_attn


def init_params(key, *, n_layers, vocab, L, H, n_out, n_heads):
    ks = jax.random.split(key, 5)
    d_head = H // n_heads
    return {
        "layer_emb": 0.1 * jax.random.normal(ks[0], (n_layers, vocab, H), jnp.float32),
        "pos_emb": 0.02 * jax.random.normal(ks[1], (n_layers, L, H), jnp.float32),
        "wq": 0.1 * jax.random.normal(ks[2], (n_heads, H, d_head), jnp.float32),
        "wk": 0.1 * jax.random.normal(ks[3], (n_heads, H, d_head), jnp.float32),
        "mix_weights": jnp.zeros((n_layers,), jnp.float32),   # ScalarMix init
        "gamma": jnp.ones((), jnp.float32),                   # ScalarMix gamma
        "proj_w": 0.1 * jax.random.normal(ks[4], (H, n_out), jnp.float32),
    }


if __name__ == "__main__":
    B, S, F = 2, 8, 4          # batch, seq_len (tokens), fix_len (pieces/token)
    H, N_OUT = 64, 32          # hidden_size, n_out (projection is non-identity)
    N_LAYERS, N_HEADS, VOCAB, PAD = 4, 2, 50, 0

    key = jax.random.PRNGKey(0)
    k1, k2, kp, kt = jax.random.split(key, 4)

    # deterministic synthetic sub-word ids with realistic padding structure
    n_tokens = jnp.array([6, 4], dtype=jnp.int32)                  # tokens / sentence
    n_pieces = jax.random.randint(k1, (B, S), 1, F + 1)            # pieces / token
    ids = jax.random.randint(k2, (B, S, F), 1, VOCAB)
    tok_valid = jnp.arange(S)[None, :] < n_tokens[:, None]
    piece_valid = jnp.arange(F)[None, None, :] < n_pieces[:, :, None]
    subwords = jnp.where(tok_valid[:, :, None] & piece_valid, ids, PAD).astype(jnp.int32)

    params = init_params(kp, n_layers=N_LAYERS, vocab=VOCAB, L=S * F,
                         H=H, n_out=N_OUT, n_heads=N_HEADS)

    embed, seq_attn = transformer_embedding_forward(subwords, params,
                                                    pad_index=PAD, attention_head=0)
    embed = jax.block_until_ready(embed)
    seq_attn = jax.block_until_ready(seq_attn)
    assert embed.shape == (B, S, N_OUT) and seq_attn.shape == (B, S, S)
    assert bool(jnp.all(jnp.isfinite(embed))) and bool(jnp.all(jnp.isfinite(seq_attn)))

    # correctness checks of the Pallas kernels against plain jnp references
    kt1, kt2, kt3 = jax.random.split(kt, 3)
    h_t = jax.random.normal(kt1, (N_LAYERS, B, S * F, H), jnp.float32)
    c_t = jax.nn.softmax(jnp.arange(N_LAYERS, dtype=jnp.float32))
    got1 = jax.block_until_ready(scalar_mix(h_t, c_t, out_dtype=jnp.float32))
    want1 = jnp.einsum("k,kblh->blh", c_t, h_t)
    assert jnp.allclose(got1, want1, atol=1e-5), "scalar_mix mismatch"

    x_t = jax.random.normal(kt2, (B, S, F, H), jnp.float32)
    inv_t = 1.0 / jax.random.randint(kt3, (B, S), 1, F + 1).astype(jnp.float32)
    got2 = jax.block_until_ready(pool_and_project(x_t, inv_t, params["proj_w"]))
    # reference uses the same bf16-cast operands (kernel: bf16 MXU, f32 accumulation)
    x_b = x_t.astype(jnp.bfloat16).astype(jnp.float32)
    w_b = params["proj_w"].astype(jnp.bfloat16).astype(jnp.float32)
    want2 = jnp.einsum("bsfh,ho->bso", x_b, w_b) * inv_t[..., None]
    assert jnp.allclose(got2, want2, atol=2e-3, rtol=2e-3), "pool_and_project mismatch"

    print("KERNEL_OK")
</pallas_src>

<mosaic_0001>
module attributes {stable_mosaic.version = 11 : i64} {
  func.func @_scalar_mix_kernel(%arg0: i32, %arg1: memref<4xf32, #tpu.memory_space<smem>>, %arg2: memref<4x16x128xf32, #tpu.memory_space<vmem>>, %arg3: memref<16x128xbf16, #tpu.memory_space<vmem>>) attributes {dimension_semantics = [#tpu.dimension_semantics<parallel>], iteration_bounds = array<i64: 2>, scalar_prefetch = 0 : i64, scratch_operands = 0 : i64, tpu.core_type = #tpu.core_type<tc>, window_params = [{transform_indices = @transform_0, window_bounds = array<i64: 4>}, {transform_indices = @transform_1, window_bounds = array<i64: 4, 16, 128>}, {transform_indices = @transform_2, window_bounds = array<i64: 16, 128>}]} {
    %c0 = arith.constant 0 : index
    %0 = memref.load %arg1[%c0] : memref<4xf32, #tpu.memory_space<smem>>
    %c0_0 = arith.constant 0 : index
    %c0_1 = arith.constant 0 : index
    %c0_2 = arith.constant 0 : index
    %1 = vector.load %arg2[%c0_0, %c0_1, %c0_2] : memref<4x16x128xf32, #tpu.memory_space<vmem>>, vector<1x16x128xf32>
    %2 = vector.shape_cast %1 : vector<1x16x128xf32> to vector<16x128xf32>
    %3 = vector.broadcast %0 : f32 to vector<16x128xf32>
    %4 = arith.mulf %3, %2 : vector<16x128xf32>
    %c1 = arith.constant 1 : index
    %5 = memref.load %arg1[%c1] : memref<4xf32, #tpu.memory_space<smem>>
    %c1_3 = arith.constant 1 : index
    %c0_4 = arith.constant 0 : index
    %c0_5 = arith.constant 0 : index
    %6 = vector.load %arg2[%c1_3, %c0_4, %c0_5] : memref<4x16x128xf32, #tpu.memory_space<vmem>>, vector<1x16x128xf32>
    %7 = vector.shape_cast %6 : vector<1x16x128xf32> to vector<16x128xf32>
    %8 = vector.broadcast %5 : f32 to vector<16x128xf32>
    %9 = arith.mulf %8, %7 : vector<16x128xf32>
    %10 = arith.addf %4, %9 : vector<16x128xf32>
    %c2 = arith.constant 2 : index
    %11 = memref.load %arg1[%c2] : memref<4xf32, #tpu.memory_space<smem>>
    %c2_6 = arith.constant 2 : index
    %c0_7 = arith.constant 0 : index
    %c0_8 = arith.constant 0 : index
    %12 = vector.load %arg2[%c2_6, %c0_7, %c0_8] : memref<4x16x128xf32, #tpu.memory_space<vmem>>, vector<1x16x128xf32>
    %13 = vector.shape_cast %12 : vector<1x16x128xf32> to vector<16x128xf32>
    %14 = vector.broadcast %11 : f32 to vector<16x128xf32>
    %15 = arith.mulf %14, %13 : vector<16x128xf32>
    %16 = arith.addf %10, %15 : vector<16x128xf32>
    %c3 = arith.constant 3 : index
    %17 = memref.load %arg1[%c3] : memref<4xf32, #tpu.memory_space<smem>>
    %c3_9 = arith.constant 3 : index
    %c0_10 = arith.constant 0 : index
    %c0_11 = arith.constant 0 : index
    %18 = vector.load %arg2[%c3_9, %c0_10, %c0_11] : memref<4x16x128xf32, #tpu.memory_space<vmem>>, vector<1x16x128xf32>
    %19 = vector.shape_cast %18 : vector<1x16x128xf32> to vector<16x128xf32>
    %20 = vector.broadcast %17 : f32 to vector<16x128xf32>
    %21 = arith.mulf %20, %19 : vector<16x128xf32>
    %22 = arith.addf %16, %21 : vector<16x128xf32>
    %23 = arith.truncf %22 : vector<16x128xf32> to vector<16x128xbf16>
    %c0_12 = arith.constant 0 : index
    %c0_13 = arith.constant 0 : index
    %24 = vector.load %arg3[%c0_12, %c0_13] : memref<16x128xbf16, #tpu.memory_space<vmem>>, vector<16x128xbf16>
    tpu.vector_store %arg3[%c0_12, %c0_13], %23 {strides = array<i32>} : memref<16x128xbf16, #tpu.memory_space<vmem>>, vector<16x128xbf16>,
    return
  }
  func.func @transform_0(%arg0: i32) -> i32 {
    %c0_i32 = arith.constant 0 : i32
    %c0_i32_0 = arith.constant 0 : i32
    return %c0_i32 : i32
  }
  func.func @transform_1(%arg0: i32) -> (i32, i32, i32) {
    %c0_i32 = arith.constant 0 : i32
    %c0_i32_0 = arith.constant 0 : i32
    %c0_i32_1 = arith.constant 0 : i32
    return %c0_i32, %arg0, %c0_i32_0 : i32, i32, i32
  }
  func.func @transform_2(%arg0: i32) -> (i32, i32) {
    %c0_i32 = arith.constant 0 : i32
    %c0_i32_0 = arith.constant 0 : i32
    return %arg0, %c0_i32 : i32, i32
  }
}

</mosaic_0001>

<bundles_post_ra>
// kernel: tpu_custom_call.1
= control target key start
LH: loop header
LB: loop body
LE: loop exit
PB: predicated region body
PF: predicated region fallthrough
CT: control target
= control target key end

     0   :  { %7 = vsyncpa [#allocation5], 0  ;;  %s714_s0 = inlined_call_operand.hbm [shape: f32[4], index: 0, kind: input, shape index: {}]   ;;  %s715_s1 = inlined_call_operand.hbm [shape: f32[4,32,128], index: 1, kind: input, shape index: {}]   ;;  %s716_s2 = inlined_call_operand.hbm [shape: bf16[32,128], index: 2, kind: output, shape index: {}]  }
   0x1   :  { %8 = vsyncpa [#allocation3], 0 }
   0x2   :  { %10 = vsyncpa [#allocation3 + $0x1], 0 }
   0x3   :  { %11 = vsyncpa [#allocation4], 0 }
   0x4   :  { %13 = vsyncpa [#allocation4 + $0x1], 0  ;;  %s554_s9 = smov 0   ;;  %s556_s10 = smov 0  }
   0x5   :  { %s558_s11 = smov 0   ;;  %s560_s12 = smov 0  }
   0x6 LB: > { %s575_s13 = sadd.s32 4294967295, %s527_s12   ;;  %s343_s14 = sadd.s32 4294967294, %s527_s12   ;;  %s527_s12 = sphi %s560_s12, %s725_s12   ;;  %s523_s11 = sphi %s558_s11, %s724_s11   ;;  %s519_s10 = sphi %s556_s10, %s723_s10   ;;  %s515_s9 = sphi %s554_s9, %s722_s9  }
   0x7   : > { %s579_s15 = sadd.s32 1, %s527_s12   ;;  %s47_s16 = sadd.s32 1, %s523_s11 }
   0x8   : > { %s44_s17 = ssub.s32 %s527_s12, %s579_s15  ;;  %p54_p0 = scmp.ne.s32.totalorder %s523_s11, %s519_s10 }
   0x9   : > { %p45_p1 = scmp.eq.s32.totalorder %s44_s17, 0  ;;  %p55_p2 = scmp.eq.s32.totalorder %s527_s12, 0 }
   0xa   : > { %p60_p3 = scmp.ne.s32.totalorder %s519_s10, %s515_s9  ;;  %p61_p4 = scmp.eq.s32.totalorder %s575_s13, 0 }
   0xb   : > { %s591_s18 = scalar_select %p45_p1, %s523_s11, %s47_s16  }
   0xc   : > { %p593_p5 = por %p55_p2, %p54_p0  ;;  %p599_p6 = por %p61_p4, %p60_p3 }
   0xd   : > { %p84_p7 = scmp.eq.s32.totalorder %s575_s13, 1  ;;  %p90_p8 = scmp.eq.s32.totalorder %s343_s14, 1 }
   0xe   : > { %p344_p9 = scmp.ge.s32.totalorder %s527_s12, 1  ;;  %p97_p10 = scmp.lt.s32.totalorder %s527_s12, 3 }
   0xf   : > { %p606_p11 = por %p84_p7, %p54_p0  ;;  %p610_p12 = por %p90_p8, %p60_p3 }
  0x10   : > { %p614_p13 = pnand %p344_p9, %p97_p10  ;;  %s529_s24 = smov [#allocation2]  }
  0x11   : > { %p346_p0 = scmp.ge.s32.totalorder %s527_s12, 2 }
  0x12   : > { %p396_p1 = pneg %p614_p13 }
  0x13   : > { %115 = sbr.rel (%p346_p0) target bundleno = 37 (0x25), region = 20 }
  0x14   : > { %p397_p2 = pnand %p396_p1, %p61_p4 }
  0x16   : > { %399 = dma.hbm_to_smem (!%p397_p2), %s714_s0, 16, %s529_s24, [#allocation5]  }
  0x18   : > { %s119_s27 = sand.u32 1, %s523_s11   ;;  %s372_s28 = sshll.u32 %s527_s12, 8 }
  0x19   : > { %s347_s29 = sshll.u32 %s119_s27, 6  ;;  %s129_s4 = scalar_lea.hbm %s715_s1, %s372_s28 }
  0x1a   : > { %s383_s5 = scalar_select %p593_p5, [#allocation0], [#allocation10] }
  0x1b   : > { %s123_s6 = scalar_lea.vmem [#allocation6], %s347_s29  ;;  %s530_s14 = smov 512  }
  0x1c   : > { %s142_s7 = sshll.u32 %s123_s6, 4  ;;  %s134_s8 = sld [smem:[%s383_s5]]   ;;  %s143_s7 = int_to_ptr.vmem [resolvable:$true] %s142_s7 }
  0x1d   : > { %384 = sst [smem:[#allocation9]] (%p593_p5), %s530_s14  ;;  %s531_s16 = smov 256  }
  0x1e   : > { %385 = sst [smem:[#allocation9 + $0x1]] (%p593_p5), %s531_s16  ;;  %s532_s17 = smov 2  }
  0x1f   : > { %386 = sst [smem:[#allocation9 + $0x2]] (%p593_p5), %s532_s17  ;;  %s533_s24 = smov 128  }
  0x20   : > { %387 = sst [smem:[#allocation9 + $0x3]] (%p593_p5), %s533_s24  ;;  %s534_s26 = smov 8  }
  0x21   : > { %388 = sst [smem:[#allocation9 + $0x4]] (%p593_p5), %s533_s24  ;;  %s120_s29 = scalar_lea.sflag [#allocation3], %s119_s27 }
  0x22   : > { %s350_s25 = sshll.u32 %s134_s8, 26  ;;  %389 = sst [smem:[#allocation9 + $0x5]] (%p593_p5), %s534_s26 }
  0x23   : > { %s351_s28 = sadd.s32 134217728, %s350_s25  ;;  %s535_s30 = smov 131072  }
  0x24   : > { %390 = dma.general (%p593_p5), %s129_s4, 1024, %s143_s7, %s120_s29, %s535_s30, [#allocation9], %s351_s28, 0  }
  0x25 PF: > { %167 = sbr.rel (%p614_p13) target bundleno = 81 (0x51), region = 28 }
  0x2a   : > { %502 = dma.done.wait (%p61_p4), [#allocation5], 16  }
  0x2b   : > { %504 = vsyncadd (%p61_p4), [#allocation5], 4294967280  ;;  %s656_s3 = sand.u32 1, %s519_s10  }
  0x2c   : > { %s354_s27 = sshll.u32 %s656_s3, 6  ;;  %s174_s5 = scalar_lea.sflag [#allocation3], %s656_s3 }
  0x2d   : > { %s177_s19 = scalar_lea.vmem [#allocation6], %s354_s27 }
  0x2e   : > { %506 = dma.done.wait (%p599_p6), %s174_s5, 1024  }
  0x2f   : > { %508 = vsyncadd (%p599_p6), %s174_s5, 4294966272 }
  0x30   : > { %182 = sfence }
  0x31   : > { %s201_s23 = sld [smem:[#allocation2]]  ;;  %v202_v0 = vld [vmem:[%s177_s19] sm:$0xff]  ;;  %v203_v1 = vld [vmem:[%s177_s19 + $0x8] sm:$0xff]  ;;  %s355_s8 = sshll.u32 %s656_s3, 3  ;;  %v357_v2 = vld [vmem:[%s177_s19 + $0x10] sm:$0xff] }
  0x32   : > { %s356_s4 = sld [smem:[#allocation2 + $0x1]]  ;;  %v358_v3 = vld [vmem:[%s177_s19 + $0x18] sm:$0xff]  ;;  %v360_v5 = vld [vmem:[%s177_s19 + $0x20] sm:$0xff]  ;;  %v361_v6 = vld [vmem:[%s177_s19 + $0x28] sm:$0xff]  ;;  %s198_s20 = scalar_lea.vmem [#allocation7], %s355_s8 }
  0x33   : > { %s359_s6 = sld [smem:[#allocation2 + $0x2]]  ;;  %v363_v10 = vld [vmem:[%s177_s19 + $0x30] sm:$0xff]  ;;  %v364_v11 = vld [vmem:[%s177_s19 + $0x38] sm:$0xff]  ;;  %s258_s14 = sshll.u32 %s198_s20, 4  ;;  %s666_s14 = int_to_ptr.vmem [resolvable:$true] %s258_s14 }
  0x34   : > { %s362_s7 = sld [smem:[#allocation2 + $0x3]]  ;;  %s375_s16 = sshll.u32 %s575_s13, 7 }
  0x35   : > { %s671_s25 = scalar_lea.hbm %s716_s2, %s375_s16  ;;  %s245_s26 = scalar_lea.sflag [#allocation4], %s656_s3 }
  0x36   : > { %s459_s28 = scalar_lea.vmem %s666_s14, 128  ;;  %s536_s13 = smov [#allocation7]  }
  0x37   : > { %v204_v4 = vstv %s201_s23  ;;  %p460_p3 = scmp.ne.s32.totalorder %s666_s14, %s459_s28  ;;  %s463_s29 = sshll.u32 %s536_s13, 4  ;;  %s464_s29 = int_to_ptr.vmem [resolvable:$false] %s463_s29 }
  0x38   : > { %v205_v7 = vmul.f32 %v204_v4, %v202_v0  ;;  %v206_v8 = vmul.f32 %v204_v4, %v203_v1  ;;  %v211_v9 = vstv %s356_s4  ;;  %s465_s30 = scalar_lea.vmem %s464_s29, 256  ;;  %p466_p6 = scmp.lt.s32.totalorder %s666_s14, %s464_s29 }
  0x39   : > { %v212_v12 = vmul.f32 %v357_v2, %v211_v9  ;;  %v213_v13 = vmul.f32 %v358_v3, %v211_v9  ;;  %v220_v14 = vstv %s359_s6  ;;  %p461_p4 = pnand %p460_p3, %p606_p11  ;;  %p467_p7 = scmp.lt.s32.totalorder %s465_s30, %s459_s28 }
  0x3a   : > { %v221_v15 = vmul.f32 %v360_v5, %v220_v14  ;;  %v222_v16 = vmul.f32 %v361_v6, %v220_v14  ;;  %v229_v17 = vstv %s362_s7 }
  0x3b   : > { %v214_v18 = vadd.f32 %v212_v12, %v205_v7  ;;  %v215_v19 = vadd.f32 %v213_v13, %v206_v8  ;;  %v230_v20 = vmul.f32 %v363_v10, %v229_v17  ;;  %v231_v21 = vmul.f32 %v364_v11, %v229_v17  ;;  %p462_p5 = pneg %p461_p4  ;;  %p468_p8 = por %p467_p7, %p466_p6 }
  0x3d   : > { %v223_v22 = vadd.f32 %v221_v15, %v214_v18  ;;  %v224_v23 = vadd.f32 %v222_v16, %v215_v19  ;;  %p469_p9 = pnand %p468_p8, %p462_p5 }
  0x3f   : > { %v232_v24 = vadd.f32 %v230_v20, %v223_v22  ;;  %v233_v25 = vadd.f32 %v231_v21, %v224_v23 }
  0x41   : > { %v379_v26 = vpack.c.bf16 %v233_v25, %v232_v24 }
  0x43   : > { %380 = vst [vmem:[%s198_s20] sm:$0xff] %v379_v26  }
  0x44   : > { %472 = shalt.err (!%p469_p9)
}
  0x45   : > { %s473_s27 = scalar_lea.hbm %s671_s25, 128  ;;  %s477_s23 = scalar_lea.hbm %s716_s2, 256 }
  0x46   : > { %p474_p10 = scmp.ne.s32.totalorder %s671_s25, %s473_s27  ;;  %p478_p2 = scmp.lt.s32.totalorder %s671_s25, %s716_s2 }
  0x47   : > { %p479_p3 = scmp.lt.s32.totalorder %s477_s23, %s473_s27 }
  0x48   : > { %p475_p13 = pnand %p474_p10, %p606_p11 }
  0x49   : > { %p480_p4 = por %p479_p3, %p478_p2 }
  0x4a   : > { %p476_p1 = pneg %p475_p13 }
  0x4c   : > { %p481_p5 = pnand %p480_p4, %p476_p1 }
  0x4e   : > { %484 = shalt.err (!%p481_p5)
}
  0x4f   : > { %s537_s7 = smov 64   ;;  %s538_s8 = smov 4  }
  0x50   : > { %394 = dma.vmem_to_hbm [thread:$0]  (%p606_p11), %s666_s14, 128, %s671_s25, %s245_s26, %s537_s7, %s537_s7, %s538_s8  }
  0x51 PF: > { %s273_s20 = sand.u32 1, %s515_s9   ;;  %p401_p6 = pnand %p346_p0, %p610_p12 }
  0x52   : > { %s274_s16 = scalar_lea.sflag [#allocation4], %s273_s20 }
  0x53   : > { %p402_p7 = pneg %p401_p6 }
  0x55   : > { %510 = dma.done.wait (%p402_p7), %s274_s16, 128  }
  0x56   : > { %512 = vsyncadd (%p402_p7), %s274_s16, 4294967168  ;;  %p16_p8 = scmp.ge.s32.totalorder %s579_s15, 4   ;;  %s722_s9 = smov %s519_s10 }
  0x57   : > { %s723_s10 = smov %s523_s11  ;;  %s724_s11 = smov %s591_s18 }
  0x58   : > { %s725_s12 = smov %s579_s15  ;;  %18 = sbr.rel (!%p16_p8) target bundleno = 6 (0x6), region = 86 }
  0x5d   :  { %279 = vsyncpa [#allocation3], 1 }
  0x5e   :  { %281 = vsyncpa [#allocation3 + $0x1], 1 }
  0x5f   :  { %282 = vsyncpa [#allocation4], 1 }
  0x60   :  { %284 = vsyncpa [#allocation4 + $0x1], 1 }
  0x61   :  { %285 = vsyncpa [#allocation5], 1 }
  0x62   :  { %287 = vsyncpa [#allocation5 + $0x1], 1 }

</bundles_post_ra>
